<compile_context>
chip_gen: v6e
topology: v6e:2x2x1
jax: 0.10.0
libtpu: 0.0.40
codegen_flags: <defaults>
</compile_context>

<pallas_src>
import functools
import math

import jax
import jax.numpy as jnp
import numpy as np
from jax.experimental import pallas as pl
from jax.experimental.pallas import tpu as pltpu


# ---------------------------------------------------------------------------
# Kernel: one full transformer block for a single batch element per grid step.
# ---------------------------------------------------------------------------
def transformer_block_kernel(
    x_ref,
    ln1_w_ref, ln1_b_ref,
    wq_ref, wk_ref, wv_ref,            # (H, D, hd) bf16 each (scale folded in wq)
    wo_ref,                            # (H, hd, D) bf16
    ln2_w_ref, ln2_b_ref,
    w1_ref, w3_ref, w2_ref,            # (D, Hd), (D, Hd), (Hd, D) bf16
    o_ref,
    *, num_heads: int, eps: float,
):
    f32 = jnp.float32
    bf16 = jnp.bfloat16

    x = x_ref[...]                     # (S, D) f32 (batch dim squeezed by BlockSpec)
    S, D = x.shape
    H = num_heads

    def layernorm(v, w_r, b_r):
        mu = jnp.mean(v, axis=-1, keepdims=True)
        var = jnp.mean((v - mu) ** 2, axis=-1, keepdims=True)   # biased, like torch
        return (v - mu) * jax.lax.rsqrt(var + eps) * w_r[...] + b_r[...]

    # ---------------- attention sub-block (pre-norm) ----------------
    xn = layernorm(x, ln1_w_ref, ln1_b_ref).astype(bf16)         # (S, D)
    # Shared broadcast over heads (leading, non-tiled dim -> cheap), reused by
    # all three fused head-projection contractions below.
    xh = jnp.broadcast_to(xn[None], (H, S, D))                   # (H, S, D) bf16

    # Fused projection + head split: MXU emits (H, S, hd) directly.
    # 1/sqrt(hd) is already folded into wq at parameter-prep time.
    qh = jnp.einsum("hsd,hdk->hsk", xh, wq_ref[...], preferred_element_type=f32)
    kh = jnp.einsum("hsd,hdk->hsk", xh, wk_ref[...], preferred_element_type=f32)
    vh = jnp.einsum("hsd,hdk->hsk", xh, wv_ref[...], preferred_element_type=f32)

    qh = qh.astype(bf16)
    kh = kh.astype(bf16)
    vh = vh.astype(bf16)

    # Batched score / softmax / PV (same contraction patterns as the flash ref).
    s = jnp.einsum("hqd,hkd->hqk", qh, kh, preferred_element_type=f32)   # (H,S,S)
    m = jnp.max(s, axis=-1, keepdims=True)
    e = jnp.exp(s - m)
    l = jnp.sum(e, axis=-1, keepdims=True)                               # (H,S,1)

    o_h = jnp.einsum("hqk,hkd->hqd", e.astype(bf16), vh,
                     preferred_element_type=f32)                          # (H,S,hd)
    # Normalize after the PV matmul; reciprocal runs on the EUP slot.
    o_h = o_h * pl.reciprocal(l, approx=True)

    # Fused head merge + output projection: no scratch slab, no masked stores.
    proj = jnp.einsum("hsd,hdo->hso", o_h.astype(bf16), wo_ref[...],
                      preferred_element_type=f32)                         # (H,S,D)
    attn = jnp.sum(proj, axis=0)                                          # (S, D)

    h1 = x + attn

    # ---------------- feed-forward sub-block (pre-norm, gated) ----------------
    hn = layernorm(h1, ln2_w_ref, ln2_b_ref).astype(bf16)
    g = jnp.dot(hn, w1_ref[...], preferred_element_type=f32)
    u = jnp.dot(hn, w3_ref[...], preferred_element_type=f32)
    gated = (g * jax.nn.sigmoid(g) * u).astype(bf16)                      # SiLU(g)*u
    ff = jnp.dot(gated, w2_ref[...], preferred_element_type=f32)

    o_ref[...] = h1 + ff


# ---------------------------------------------------------------------------
# One-time parameter preparation (bf16 cast, head reshape, scale folding).
# This runs once at init, NOT per call, so the kernel's bf16 DMA is the only
# per-call weight HBM traffic.
# ---------------------------------------------------------------------------
def prepare_params(params, *, num_heads: int):
    bf16 = jnp.bfloat16
    f32 = jnp.float32
    D = params["wq"].shape[0]
    hd = D // num_heads
    scale = 1.0 / math.sqrt(hd)

    def to_heads_in(w):                # (D, D) -> (H, D, hd): column-block per head
        return jnp.transpose(w.reshape(D, num_heads, hd), (1, 0, 2))

    return {
        "ln1_w": params["ln1_w"].astype(f32),
        "ln1_b": params["ln1_b"].astype(f32),
        "wq_h": to_heads_in(params["wq"] * scale).astype(bf16),   # scale folded
        "wk_h": to_heads_in(params["wk"]).astype(bf16),
        "wv_h": to_heads_in(params["wv"]).astype(bf16),
        "wo_h": params["wo"].reshape(num_heads, hd, D).astype(bf16),
        "ln2_w": params["ln2_w"].astype(f32),
        "ln2_b": params["ln2_b"].astype(f32),
        "w1": params["w1"].astype(bf16),
        "w3": params["w3"].astype(bf16),
        "w2": params["w2"].astype(bf16),
    }


# ---------------------------------------------------------------------------
# Wrapper (jitted; weights arrive pre-cast / pre-reshaped)
# ---------------------------------------------------------------------------
@functools.partial(jax.jit, static_argnames=("num_heads", "eps"))
def transformer_block(x, kp, *, num_heads: int, eps: float = 1e-5):
    B, S, D = x.shape
    H = num_heads
    hd = D // H
    Hd = kp["w1"].shape[1]

    kernel = functools.partial(
        transformer_block_kernel, num_heads=num_heads, eps=eps
    )

    def const_spec(shape):
        # Whole-array block, constant index map -> fetched once across the grid.
        return pl.BlockSpec(shape, lambda b: (0,) * len(shape))

    in_specs = [
        # x: one batch row per step; leading dim squeezed so kernel sees (S, D).
        pl.BlockSpec((None, S, D), lambda b: (b, 0, 0)),
        const_spec((1, D)), const_spec((1, D)),            # ln1 weight / bias (f32)
        const_spec((H, D, hd)), const_spec((H, D, hd)),    # wq_h, wk_h (bf16)
        const_spec((H, D, hd)),                            # wv_h (bf16)
        const_spec((H, hd, D)),                            # wo_h (bf16)
        const_spec((1, D)), const_spec((1, D)),            # ln2 weight / bias (f32)
        const_spec((D, Hd)), const_spec((D, Hd)),          # w1, w3 (bf16)
        const_spec((Hd, D)),                               # w2 (bf16)
    ]

    return pl.pallas_call(
        kernel,
        out_shape=jax.ShapeDtypeStruct((B, S, D), jnp.float32),
        grid=(B,),
        in_specs=in_specs,
        out_specs=pl.BlockSpec((None, S, D), lambda b: (b, 0, 0)),
        compiler_params=pltpu.CompilerParams(
            dimension_semantics=("parallel",),             # megacore split over batch
            # TODO(synk): at production dims raise vmem_limit_bytes (v5e/v6e)
            # or switch to K-tiled FFN + flash KV tiling (v7x, 64 MiB VMEM).
        ),
    )(
        x,
        kp["ln1_w"], kp["ln1_b"],
        kp["wq_h"], kp["wk_h"], kp["wv_h"], kp["wo_h"],
        kp["ln2_w"], kp["ln2_b"],
        kp["w1"], kp["w3"], kp["w2"],
    )


# ---------------------------------------------------------------------------
# Pure-JAX reference (f32) for a correctness check
# ---------------------------------------------------------------------------
def transformer_block_ref(x, params, *, num_heads: int, eps: float = 1e-5):
    def layernorm(v, w, b):
        mu = jnp.mean(v, axis=-1, keepdims=True)
        var = jnp.mean((v - mu) ** 2, axis=-1, keepdims=True)
        return (v - mu) * jax.lax.rsqrt(var + eps) * w[0] + b[0]

    B, S, D = x.shape
    hd = D // num_heads

    xn = layernorm(x, params["ln1_w"], params["ln1_b"])
    q = xn @ params["wq"]
    k = xn @ params["wk"]
    v = xn @ params["wv"]
    q = q.reshape(B, S, num_heads, hd).transpose(0, 2, 1, 3)
    k = k.reshape(B, S, num_heads, hd).transpose(0, 2, 1, 3)
    v = v.reshape(B, S, num_heads, hd).transpose(0, 2, 1, 3)
    s = jnp.einsum("bhqd,bhkd->bhqk", q, k) / math.sqrt(hd)
    p = jax.nn.softmax(s, axis=-1)
    attn = jnp.einsum("bhqk,bhkd->bhqd", p, v).transpose(0, 2, 1, 3).reshape(B, S, D)
    h1 = x + attn @ params["wo"]

    hn = layernorm(h1, params["ln2_w"], params["ln2_b"])
    g = hn @ params["w1"]
    u = hn @ params["w3"]
    ff = (jax.nn.silu(g) * u) @ params["w2"]
    return h1 + ff


# ---------------------------------------------------------------------------
# Main
# ---------------------------------------------------------------------------
if __name__ == "__main__":
    # Module hyperparameters (small, forward-consistent shapes)
    B, S, D = 2, 8, 32
    num_heads = 4
    multiple_of = 16
    hidden_dim_multiplier = 4
    eps = 1e-5

    # GatedMultiLayerPerceptron hidden dim (LLaMA-style rounding)
    hidden = int(2 * (D * hidden_dim_multiplier) / 3)
    hidden = multiple_of * ((hidden + multiple_of - 1) // multiple_of)   # -> 96

    key = jax.random.PRNGKey(0)
    keys = jax.random.split(key, 13)

    def w(k, shape, scale=0.05):
        return scale * jax.random.normal(k, shape, dtype=jnp.float32)

    params = {
        "ln1_w": 1.0 + w(keys[0], (1, D), 0.1),
        "ln1_b": w(keys[1], (1, D), 0.1),
        "wq": w(keys[2], (D, D)),
        "wk": w(keys[3], (D, D)),
        "wv": w(keys[4], (D, D)),
        "wo": w(keys[5], (D, D)),
        "ln2_w": 1.0 + w(keys[6], (1, D), 0.1),
        "ln2_b": w(keys[7], (1, D), 0.1),
        "w1": w(keys[8], (D, hidden)),
        "w3": w(keys[9], (D, hidden)),
        "w2": w(keys[10], (hidden, D)),
    }

    x = jax.random.normal(keys[11], (B, S, D), dtype=jnp.float32)

    # One-time weight prep (bf16 cast, head reshape, scale folding).
    kparams = prepare_params(params, num_heads=num_heads)
    kparams = jax.block_until_ready(kparams)

    out = transformer_block(x, kparams, num_heads=num_heads, eps=eps)
    out = jax.block_until_ready(out)

    ref = transformer_block_ref(x, params, num_heads=num_heads, eps=eps)
    assert out.shape == (B, S, D)
    # bf16 MXU inputs (f32 accumulation) + approx reciprocal -> relaxed tolerance.
    assert np.allclose(np.asarray(out), np.asarray(ref), rtol=2e-2, atol=2e-2), (
        "Pallas kernel does not match JAX reference"
    )
    print("KERNEL_OK")
</pallas_src>

<mosaic_0001>
module attributes {stable_mosaic.version = 11 : i64} {
  func.func @transformer_block_kernel(%arg0: i32, %arg1: memref<1x8x32xf32, #tpu.memory_space<vmem>>, %arg2: memref<1x32xf32, #tpu.memory_space<vmem>>, %arg3: memref<1x32xf32, #tpu.memory_space<vmem>>, %arg4: memref<4x32x8xbf16, #tpu.memory_space<vmem>>, %arg5: memref<4x32x8xbf16, #tpu.memory_space<vmem>>, %arg6: memref<4x32x8xbf16, #tpu.memory_space<vmem>>, %arg7: memref<4x8x32xbf16, #tpu.memory_space<vmem>>, %arg8: memref<1x32xf32, #tpu.memory_space<vmem>>, %arg9: memref<1x32xf32, #tpu.memory_space<vmem>>, %arg10: memref<32x96xbf16, #tpu.memory_space<vmem>>, %arg11: memref<32x96xbf16, #tpu.memory_space<vmem>>, %arg12: memref<96x32xbf16, #tpu.memory_space<vmem>>, %arg13: memref<1x8x32xf32, #tpu.memory_space<vmem>>) attributes {dimension_semantics = [#tpu.dimension_semantics<parallel>], iteration_bounds = array<i64: 2>, scalar_prefetch = 0 : i64, scratch_operands = 0 : i64, tpu.core_type = #tpu.core_type<tc>, window_params = [{transform_indices = @transform_0, window_bounds = array<i64: 1, 8, 32>}, {pipeline_mode = #tpu.pipeline_mode<synchronous>, transform_indices = @transform_1, window_bounds = array<i64: 1, 32>}, {pipeline_mode = #tpu.pipeline_mode<synchronous>, transform_indices = @transform_2, window_bounds = array<i64: 1, 32>}, {pipeline_mode = #tpu.pipeline_mode<synchronous>, transform_indices = @transform_3, window_bounds = array<i64: 4, 32, 8>}, {pipeline_mode = #tpu.pipeline_mode<synchronous>, transform_indices = @transform_4, window_bounds = array<i64: 4, 32, 8>}, {pipeline_mode = #tpu.pipeline_mode<synchronous>, transform_indices = @transform_5, window_bounds = array<i64: 4, 32, 8>}, {pipeline_mode = #tpu.pipeline_mode<synchronous>, transform_indices = @transform_6, window_bounds = array<i64: 4, 8, 32>}, {pipeline_mode = #tpu.pipeline_mode<synchronous>, transform_indices = @transform_7, window_bounds = array<i64: 1, 32>}, {pipeline_mode = #tpu.pipeline_mode<synchronous>, transform_indices = @transform_8, window_bounds = array<i64: 1, 32>}, {pipeline_mode = #tpu.pipeline_mode<synchronous>, transform_indices = @transform_9, window_bounds = array<i64: 32, 96>}, {pipeline_mode = #tpu.pipeline_mode<synchronous>, transform_indices = @transform_10, window_bounds = array<i64: 32, 96>}, {pipeline_mode = #tpu.pipeline_mode<synchronous>, transform_indices = @transform_11, window_bounds = array<i64: 96, 32>}, {transform_indices = @transform_12, window_bounds = array<i64: 1, 8, 32>}]} {
    %c0 = arith.constant 0 : index
    %c0_0 = arith.constant 0 : index
    %c0_1 = arith.constant 0 : index
    %0 = vector.load %arg1[%c0, %c0_0, %c0_1] : memref<1x8x32xf32, #tpu.memory_space<vmem>>, vector<1x8x32xf32>
    %1 = vector.shape_cast %0 : vector<1x8x32xf32> to vector<8x32xf32>
    %cst = arith.constant dense<0.000000e+00> : vector<8xf32>
    %2 = vector.multi_reduction <add>, %1, %cst [1] : vector<8x32xf32> to vector<8xf32>
    %3 = vector.shape_cast %2 : vector<8xf32> to vector<8x1xf32>
    %cst_2 = arith.constant 3.200000e+01 : f32
    %4 = vector.broadcast %cst_2 : f32 to vector<8x1xf32>
    %5 = arith.divf %3, %4 : vector<8x1xf32>
    %6 = vector.broadcast %5 : vector<8x1xf32> to vector<8x32xf32>
    %7 = arith.subf %1, %6 : vector<8x32xf32>
    %8 = arith.mulf %7, %7 : vector<8x32xf32>
    %cst_3 = arith.constant dense<0.000000e+00> : vector<8xf32>
    %9 = vector.multi_reduction <add>, %8, %cst_3 [1] : vector<8x32xf32> to vector<8xf32>
    %10 = vector.shape_cast %9 : vector<8xf32> to vector<8x1xf32>
    %cst_4 = arith.constant 3.200000e+01 : f32
    %11 = vector.broadcast %cst_4 : f32 to vector<8x1xf32>
    %12 = arith.divf %10, %11 : vector<8x1xf32>
    %13 = vector.broadcast %5 : vector<8x1xf32> to vector<8x32xf32>
    %14 = arith.subf %1, %13 : vector<8x32xf32>
    %cst_5 = arith.constant 9.99999974E-6 : f32
    %15 = vector.broadcast %cst_5 : f32 to vector<8x1xf32>
    %16 = arith.addf %12, %15 : vector<8x1xf32>
    %17 = math.rsqrt %16 : vector<8x1xf32>
    %18 = vector.broadcast %17 : vector<8x1xf32> to vector<8x32xf32>
    %19 = arith.mulf %14, %18 : vector<8x32xf32>
    %c0_6 = arith.constant 0 : index
    %c0_7 = arith.constant 0 : index
    %20 = vector.load %arg2[%c0_6, %c0_7] : memref<1x32xf32, #tpu.memory_space<vmem>>, vector<1x32xf32>
    %21 = vector.broadcast %20 : vector<1x32xf32> to vector<8x32xf32>
    %22 = arith.mulf %19, %21 : vector<8x32xf32>
    %c0_8 = arith.constant 0 : index
    %c0_9 = arith.constant 0 : index
    %23 = vector.load %arg3[%c0_8, %c0_9] : memref<1x32xf32, #tpu.memory_space<vmem>>, vector<1x32xf32>
    %24 = vector.broadcast %23 : vector<1x32xf32> to vector<8x32xf32>
    %25 = arith.addf %22, %24 : vector<8x32xf32>
    %26 = arith.truncf %25 : vector<8x32xf32> to vector<8x32xbf16>
    %27 = vector.shape_cast %26 : vector<8x32xbf16> to vector<1x8x32xbf16>
    %28 = vector.shape_cast %27 : vector<1x8x32xbf16> to vector<1x8x32xbf16>
    %29 = vector.broadcast %28 : vector<1x8x32xbf16> to vector<4x8x32xbf16>
    %c0_10 = arith.constant 0 : index
    %c0_11 = arith.constant 0 : index
    %c0_12 = arith.constant 0 : index
    %30 = vector.load %arg4[%c0_10, %c0_11, %c0_12] : memref<4x32x8xbf16, #tpu.memory_space<vmem>>, vector<4x32x8xbf16>
    "tpu.trace_start"() <{level = 10 : i32, message = "hsd,hdk->hsk"}> : () -> ()
    %cst_13 = arith.constant dense<0.000000e+00> : vector<4x8x8xf32>
    %31 = tpu.matmul %29, %30, %cst_13 {dimension_numbers = #tpu.dot_dimension_numbers<[2], [1], [1], [2], [0, 0, 0, 1, 1, 2], [0], [0]>} : vector<4x8x32xbf16>, vector<4x32x8xbf16>, vector<4x8x8xf32> -> vector<4x8x8xf32>
    "tpu.trace_stop"() : () -> ()
    %c0_14 = arith.constant 0 : index
    %c0_15 = arith.constant 0 : index
    %c0_16 = arith.constant 0 : index
    %32 = vector.load %arg5[%c0_14, %c0_15, %c0_16] : memref<4x32x8xbf16, #tpu.memory_space<vmem>>, vector<4x32x8xbf16>
    "tpu.trace_start"() <{level = 10 : i32, message = "hsd,hdk->hsk"}> : () -> ()
    %cst_17 = arith.constant dense<0.000000e+00> : vector<4x8x8xf32>
    %33 = tpu.matmul %29, %32, %cst_17 {dimension_numbers = #tpu.dot_dimension_numbers<[2], [1], [1], [2], [0, 0, 0, 1, 1, 2], [0], [0]>} : vector<4x8x32xbf16>, vector<4x32x8xbf16>, vector<4x8x8xf32> -> vector<4x8x8xf32>
    "tpu.trace_stop"() : () -> ()
    %c0_18 = arith.constant 0 : index
    %c0_19 = arith.constant 0 : index
    %c0_20 = arith.constant 0 : index
    %34 = vector.load %arg6[%c0_18, %c0_19, %c0_20] : memref<4x32x8xbf16, #tpu.memory_space<vmem>>, vector<4x32x8xbf16>
    "tpu.trace_start"() <{level = 10 : i32, message = "hsd,hdk->hsk"}> : () -> ()
    %cst_21 = arith.constant dense<0.000000e+00> : vector<4x8x8xf32>
    %35 = tpu.matmul %29, %34, %cst_21 {dimension_numbers = #tpu.dot_dimension_numbers<[2], [1], [1], [2], [0, 0, 0, 1, 1, 2], [0], [0]>} : vector<4x8x32xbf16>, vector<4x32x8xbf16>, vector<4x8x8xf32> -> vector<4x8x8xf32>
    "tpu.trace_stop"() : () -> ()
    %36 = arith.truncf %31 : vector<4x8x8xf32> to vector<4x8x8xbf16>
    %37 = arith.truncf %33 : vector<4x8x8xf32> to vector<4x8x8xbf16>
    %38 = arith.truncf %35 : vector<4x8x8xf32> to vector<4x8x8xbf16>
    "tpu.trace_start"() <{level = 10 : i32, message = "hqd,hkd->hqk"}> : () -> ()
    %cst_22 = arith.constant dense<0.000000e+00> : vector<4x8x8xf32>
    %39 = tpu.matmul %36, %37, %cst_22 {dimension_numbers = #tpu.dot_dimension_numbers<[2], [2], [1], [1], [0, 0, 0, 1, 1, 1], [0], [0]>} : vector<4x8x8xbf16>, vector<4x8x8xbf16>, vector<4x8x8xf32> -> vector<4x8x8xf32>
    "tpu.trace_stop"() : () -> ()
    %cst_23 = arith.constant dense<0xFF800000> : vector<4x8xf32>
    %40 = vector.multi_reduction <maximumf>, %39, %cst_23 [2] : vector<4x8x8xf32> to vector<4x8xf32>
    %41 = vector.shape_cast %40 : vector<4x8xf32> to vector<4x8x1xf32>
    %42 = vector.broadcast %41 : vector<4x8x1xf32> to vector<4x8x8xf32>
    %43 = arith.subf %39, %42 : vector<4x8x8xf32>
    %44 = math.exp %43 : vector<4x8x8xf32>
    %cst_24 = arith.constant dense<0.000000e+00> : vector<4x8xf32>
    %45 = vector.multi_reduction <add>, %44, %cst_24 [2] : vector<4x8x8xf32> to vector<4x8xf32>
    %46 = vector.shape_cast %45 : vector<4x8xf32> to vector<4x8x1xf32>
    %47 = arith.truncf %44 : vector<4x8x8xf32> to vector<4x8x8xbf16>
    "tpu.trace_start"() <{level = 10 : i32, message = "hqk,hkd->hqd"}> : () -> ()
    %cst_25 = arith.constant dense<0.000000e+00> : vector<4x8x8xf32>
    %48 = tpu.matmul %47, %38, %cst_25 {dimension_numbers = #tpu.dot_dimension_numbers<[2], [1], [1], [2], [0, 0, 0, 1, 1, 2], [0], [0]>} : vector<4x8x8xbf16>, vector<4x8x8xbf16>, vector<4x8x8xf32> -> vector<4x8x8xf32>
    "tpu.trace_stop"() : () -> ()
    %49 = tpu.reciprocal %46 {approx = true} : vector<4x8x1xf32> -> vector<4x8x1xf32>
    %50 = vector.broadcast %49 : vector<4x8x1xf32> to vector<4x8x8xf32>
    %51 = arith.mulf %48, %50 : vector<4x8x8xf32>
    %52 = arith.truncf %51 : vector<4x8x8xf32> to vector<4x8x8xbf16>
    %c0_26 = arith.constant 0 : index
    %c0_27 = arith.constant 0 : index
    %c0_28 = arith.constant 0 : index
    %53 = vector.load %arg7[%c0_26, %c0_27, %c0_28] : memref<4x8x32xbf16, #tpu.memory_space<vmem>>, vector<4x8x32xbf16>
    "tpu.trace_start"() <{level = 10 : i32, message = "hsd,hdo->hso"}> : () -> ()
    %cst_29 = arith.constant dense<0.000000e+00> : vector<4x8x32xf32>
    %54 = tpu.matmul %52, %53, %cst_29 {dimension_numbers = #tpu.dot_dimension_numbers<[2], [1], [1], [2], [0, 0, 0, 1, 1, 2], [0], [0]>} : vector<4x8x8xbf16>, vector<4x8x32xbf16>, vector<4x8x32xf32> -> vector<4x8x32xf32>
    "tpu.trace_stop"() : () -> ()
    %cst_30 = arith.constant dense<0.000000e+00> : vector<8x32xf32>
    %55 = vector.multi_reduction <add>, %54, %cst_30 [0] : vector<4x8x32xf32> to vector<8x32xf32>
    %56 = arith.addf %1, %55 : vector<8x32xf32>
    %cst_31 = arith.constant dense<0.000000e+00> : vector<8xf32>
    %57 = vector.multi_reduction <add>, %56, %cst_31 [1] : vector<8x32xf32> to vector<8xf32>
    %58 = vector.shape_cast %57 : vector<8xf32> to vector<8x1xf32>
    %cst_32 = arith.constant 3.200000e+01 : f32
    %59 = vector.broadcast %cst_32 : f32 to vector<8x1xf32>
    %60 = arith.divf %58, %59 : vector<8x1xf32>
    %61 = vector.broadcast %60 : vector<8x1xf32> to vector<8x32xf32>
    %62 = arith.subf %56, %61 : vector<8x32xf32>
    %63 = arith.mulf %62, %62 : vector<8x32xf32>
    %cst_33 = arith.constant dense<0.000000e+00> : vector<8xf32>
    %64 = vector.multi_reduction <add>, %63, %cst_33 [1] : vector<8x32xf32> to vector<8xf32>
    %65 = vector.shape_cast %64 : vector<8xf32> to vector<8x1xf32>
    %cst_34 = arith.constant 3.200000e+01 : f32
    %66 = vector.broadcast %cst_34 : f32 to vector<8x1xf32>
    %67 = arith.divf %65, %66 : vector<8x1xf32>
    %68 = vector.broadcast %60 : vector<8x1xf32> to vector<8x32xf32>
    %69 = arith.subf %56, %68 : vector<8x32xf32>
    %cst_35 = arith.constant 9.99999974E-6 : f32
    %70 = vector.broadcast %cst_35 : f32 to vector<8x1xf32>
    %71 = arith.addf %67, %70 : vector<8x1xf32>
    %72 = math.rsqrt %71 : vector<8x1xf32>
    %73 = vector.broadcast %72 : vector<8x1xf32> to vector<8x32xf32>
    %74 = arith.mulf %69, %73 : vector<8x32xf32>
    %c0_36 = arith.constant 0 : index
    %c0_37 = arith.constant 0 : index
    %75 = vector.load %arg8[%c0_36, %c0_37] : memref<1x32xf32, #tpu.memory_space<vmem>>, vector<1x32xf32>
    %76 = vector.broadcast %75 : vector<1x32xf32> to vector<8x32xf32>
    %77 = arith.mulf %74, %76 : vector<8x32xf32>
    %c0_38 = arith.constant 0 : index
    %c0_39 = arith.constant 0 : index
    %78 = vector.load %arg9[%c0_38, %c0_39] : memref<1x32xf32, #tpu.memory_space<vmem>>, vector<1x32xf32>
    %79 = vector.broadcast %78 : vector<1x32xf32> to vector<8x32xf32>
    %80 = arith.addf %77, %79 : vector<8x32xf32>
    %81 = arith.truncf %80 : vector<8x32xf32> to vector<8x32xbf16>
    %c0_40 = arith.constant 0 : index
    %c0_41 = arith.constant 0 : index
    %82 = vector.load %arg10[%c0_40, %c0_41] : memref<32x96xbf16, #tpu.memory_space<vmem>>, vector<32x96xbf16>
    %cst_42 = arith.constant dense<0.000000e+00> : vector<8x96xf32>
    %83 = tpu.matmul %81, %82, %cst_42 {dimension_numbers = #tpu.dot_dimension_numbers<[1], [0], [0], [1], [0, 0, 1, 1], [], []>} : vector<8x32xbf16>, vector<32x96xbf16>, vector<8x96xf32> -> vector<8x96xf32>
    %c0_43 = arith.constant 0 : index
    %c0_44 = arith.constant 0 : index
    %84 = vector.load %arg11[%c0_43, %c0_44] : memref<32x96xbf16, #tpu.memory_space<vmem>>, vector<32x96xbf16>
    %cst_45 = arith.constant dense<0.000000e+00> : vector<8x96xf32>
    %85 = tpu.matmul %81, %84, %cst_45 {dimension_numbers = #tpu.dot_dimension_numbers<[1], [0], [0], [1], [0, 0, 1, 1], [], []>} : vector<8x32xbf16>, vector<32x96xbf16>, vector<8x96xf32> -> vector<8x96xf32>
    %86 = arith.negf %83 : vector<8x96xf32>
    %87 = math.exp %86 : vector<8x96xf32>
    %cst_46 = arith.constant 1.000000e+00 : f32
    %88 = vector.broadcast %cst_46 : f32 to vector<8x96xf32>
    %89 = arith.addf %88, %87 : vector<8x96xf32>
    %90 = arith.divf %88, %89 : vector<8x96xf32>
    %91 = arith.mulf %83, %90 : vector<8x96xf32>
    %92 = arith.mulf %91, %85 : vector<8x96xf32>
    %93 = arith.truncf %92 : vector<8x96xf32> to vector<8x96xbf16>
    %c0_47 = arith.constant 0 : index
    %c0_48 = arith.constant 0 : index
    %94 = vector.load %arg12[%c0_47, %c0_48] : memref<96x32xbf16, #tpu.memory_space<vmem>>, vector<96x32xbf16>
    %cst_49 = arith.constant dense<0.000000e+00> : vector<8x32xf32>
    %95 = tpu.matmul %93, %94, %cst_49 {dimension_numbers = #tpu.dot_dimension_numbers<[1], [0], [0], [1], [0, 0, 1, 1], [], []>} : vector<8x96xbf16>, vector<96x32xbf16>, vector<8x32xf32> -> vector<8x32xf32>
    %96 = arith.addf %56, %95 : vector<8x32xf32>
    %c0_50 = arith.constant 0 : index
    %c0_51 = arith.constant 0 : index
    %c0_52 = arith.constant 0 : index
    %97 = vector.load %arg13[%c0_50, %c0_51, %c0_52] : memref<1x8x32xf32, #tpu.memory_space<vmem>>, vector<1x8x32xf32>
    %98 = vector.shape_cast %97 : vector<1x8x32xf32> to vector<8x32xf32>
    %99 = vector.shape_cast %96 : vector<8x32xf32> to vector<1x8x32xf32>
    tpu.vector_store %arg13[%c0_50, %c0_51, %c0_52], %99 {strides = array<i32>} : memref<1x8x32xf32, #tpu.memory_space<vmem>>, vector<1x8x32xf32>,
    return
  }
  func.func @transform_0(%arg0: i32) -> (i32, i32, i32) {
    %c0_i32 = arith.constant 0 : i32
    %c0_i32_0 = arith.constant 0 : i32
    %c0_i32_1 = arith.constant 0 : i32
    return %arg0, %c0_i32, %c0_i32_0 : i32, i32, i32
  }
  func.func @transform_1(%arg0: i32) -> (i32, i32) {
    %c0_i32 = arith.constant 0 : i32
    %c0_i32_0 = arith.constant 0 : i32
    %c0_i32_1 = arith.constant 0 : i32
    return %c0_i32, %c0_i32_0 : i32, i32
  }
  func.func @transform_2(%arg0: i32) -> (i32, i32) {
    %c0_i32 = arith.constant 0 : i32
    %c0_i32_0 = arith.constant 0 : i32
    %c0_i32_1 = arith.constant 0 : i32
    return %c0_i32, %c0_i32_0 : i32, i32
  }
  func.func @transform_3(%arg0: i32) -> (i32, i32, i32) {
    %c0_i32 = arith.constant 0 : i32
    %c0_i32_0 = arith.constant 0 : i32
    %c0_i32_1 = arith.constant 0 : i32
    %c0_i32_2 = arith.constant 0 : i32
    return %c0_i32, %c0_i32_0, %c0_i32_1 : i32, i32, i32
  }
  func.func @transform_4(%arg0: i32) -> (i32, i32, i32) {
    %c0_i32 = arith.constant 0 : i32
    %c0_i32_0 = arith.constant 0 : i32
    %c0_i32_1 = arith.constant 0 : i32
    %c0_i32_2 = arith.constant 0 : i32
    return %c0_i32, %c0_i32_0, %c0_i32_1 : i32, i32, i32
  }
  func.func @transform_5(%arg0: i32) -> (i32, i32, i32) {
    %c0_i32 = arith.constant 0 : i32
    %c0_i32_0 = arith.constant 0 : i32
    %c0_i32_1 = arith.constant 0 : i32
    %c0_i32_2 = arith.constant 0 : i32
    return %c0_i32, %c0_i32_0, %c0_i32_1 : i32, i32, i32
  }
  func.func @transform_6(%arg0: i32) -> (i32, i32, i32) {
    %c0_i32 = arith.constant 0 : i32
    %c0_i32_0 = arith.constant 0 : i32
    %c0_i32_1 = arith.constant 0 : i32
    %c0_i32_2 = arith.constant 0 : i32
    return %c0_i32, %c0_i32_0, %c0_i32_1 : i32, i32, i32
  }
  func.func @transform_7(%arg0: i32) -> (i32, i32) {
    %c0_i32 = arith.constant 0 : i32
    %c0_i32_0 = arith.constant 0 : i32
    %c0_i32_1 = arith.constant 0 : i32
    return %c0_i32, %c0_i32_0 : i32, i32
  }
  func.func @transform_8(%arg0: i32) -> (i32, i32) {
    %c0_i32 = arith.constant 0 : i32
    %c0_i32_0 = arith.constant 0 : i32
    %c0_i32_1 = arith.constant 0 : i32
    return %c0_i32, %c0_i32_0 : i32, i32
  }
  func.func @transform_9(%arg0: i32) -> (i32, i32) {
    %c0_i32 = arith.constant 0 : i32
    %c0_i32_0 = arith.constant 0 : i32
    %c0_i32_1 = arith.constant 0 : i32
    return %c0_i32, %c0_i32_0 : i32, i32
  }
  func.func @transform_10(%arg0: i32) -> (i32, i32) {
    %c0_i32 = arith.constant 0 : i32
    %c0_i32_0 = arith.constant 0 : i32
    %c0_i32_1 = arith.constant 0 : i32
    return %c0_i32, %c0_i32_0 : i32, i32
  }
  func.func @transform_11(%arg0: i32) -> (i32, i32) {
    %c0_i32 = arith.constant 0 : i32
    %c0_i32_0 = arith.constant 0 : i32
    %c0_i32_1 = arith.constant 0 : i32
    return %c0_i32, %c0_i32_0 : i32, i32
  }
  func.func @transform_12(%arg0: i32) -> (i32, i32, i32) {
    %c0_i32 = arith.constant 0 : i32
    %c0_i32_0 = arith.constant 0 : i32
    %c0_i32_1 = arith.constant 0 : i32
    return %arg0, %c0_i32, %c0_i32_0 : i32, i32, i32
  }
}

</mosaic_0001>

<bundles_post_ra>
// kernel: transformer_block.1
= control target key start
LH: loop header
LB: loop body
LE: loop exit
PB: predicated region body
PF: predicated region fallthrough
CT: control target
= control target key end

     0   :  { %s3059_s0 = inlined_call_operand.vmem [shape: f32[2,8,32], index: 0, kind: input, shape index: {}]   ;;  %s3060_s1 = inlined_call_operand.vmem [shape: f32[1,32], index: 1, kind: input, shape index: {}]   ;;  %s3061_s2 = inlined_call_operand.vmem [shape: f32[1,32], index: 2, kind: input, shape index: {}]   ;;  %s3062_s3 = inlined_call_operand.vmem [shape: bf16[4,32,8], index: 3, kind: input, shape index: {}]   ;;  %s3063_s4 = inlined_call_operand.vmem [shape: bf16[4,32,8], index: 4, kind: input, shape index: {}]   ;;  %s3064_s5 = inlined_call_operand.vmem [shape: bf16[4,32,8], index: 5, kind: input, shape index: {}]   ;;  %s3065_s6 = inlined_call_operand.vmem [shape: bf16[4,8,32], index: 6, kind: input, shape index: {}]   ;;  %s3066_s7 = inlined_call_operand.vmem [shape: f32[1,32], index: 7, kind: input, shape index: {}]   ;;  %s3067_s8 = inlined_call_operand.vmem [shape: f32[1,32], index: 8, kind: input, shape index: {}]   ;;  %s3068_s9 = inlined_call_operand.vmem [shape: bf16[32,96], index: 9, kind: input, shape index: {}]   ;;  %s3069_s10 = inlined_call_operand.vmem [shape: bf16[32,96], index: 10, kind: input, shape index: {}]   ;;  %s3070_s11 = inlined_call_operand.vmem [shape: bf16[96,32], index: 11, kind: input, shape index: {}]   ;;  %s3071_s12 = inlined_call_operand.hbm [shape: f32[2,8,32], index: 12, kind: output, shape index: {}]  }
   0x1   :  { %3072 = sst [smem:[#allocation5_spill]] %s3059_s0 }
   0x2   :  { %3073 = sst [smem:[#allocation6_spill]] %s3060_s1 }
   0x3   :  { %17 = vsyncpa [#allocation3], 0 }
   0x4   :  { %19 = vsyncpa [#allocation3 + $0x1], 0  ;;  %s2647_s21 = smov 0   ;;  %s2649_s22 = smov 0  }
   0x5   :  { %s2651_s23 = smov 0   ;;  %s2653_s24 = smov 0  }
   0x6 LB: > { %s2668_s25 = sadd.s32 4294967295, %s2577_s24   ;;  %s2069_s26 = sadd.s32 4294967294, %s2577_s24   ;;  %s2577_s24 = sphi %s2653_s24, %s3081_s24   ;;  %s2573_s23 = sphi %s2651_s23, %s3080_s23   ;;  %s2569_s22 = sphi %s2649_s22, %s3079_s22   ;;  %s2565_s21 = sphi %s2647_s21, %s3078_s21  }
   0x7   : > { %s2672_s27 = sadd.s32 1, %s2577_s24   ;;  %s289_s28 = sadd.s32 1, %s2573_s23 }
   0x8   : > { %s286_s29 = ssub.s32 %s2577_s24, %s2672_s27  ;;  %p299_p0 = scmp.ne.s32.totalorder %s2573_s23, %s2569_s22 }
   0x9   : > { %p287_p1 = scmp.eq.s32.totalorder %s286_s29, 0  ;;  %p300_p2 = scmp.eq.s32.totalorder %s2668_s25, 1 }
   0xa   : > { %p305_p3 = scmp.ne.s32.totalorder %s2569_s22, %s2565_s21  ;;  %p306_p4 = scmp.eq.s32.totalorder %s2069_s26, 1 }
   0xb   : > { %s2683_s30 = scalar_select %p287_p1, %s2573_s23, %s289_s28  }
   0xc   : > { %p2685_p5 = por %p300_p2, %p299_p0  ;;  %p2689_p6 = por %p306_p4, %p305_p3 }
   0xd   : > { %p2072_p7 = scmp.ge.s32.totalorder %s2577_s24, 1  ;;  %p364_p8 = scmp.lt.s32.totalorder %s2577_s24, 3 }
   0xf   : > { %p365_p9 = pnand %p2072_p7, %p364_p8 }
  0x10   : > { %p405_p10 = scmp.lt.s32.totalorder (!%p365_p9), %s2668_s25, 1  ;;  %s3076_s0 = sld [smem:[#allocation5_spill]] (!%p365_p9) }
  0x11   : > { %368 = sbr.rel (%p365_p9) target bundleno = 2069 (0x815), region = 68  ;;  %s3077_s1 = sld [smem:[#allocation6_spill]] (!%p365_p9) }
  0x12   : > { %s402_s29 = sand.u32 (!%p365_p9), 1, %s2569_s22  }
  0x16   : > { %s406_s15 = scalar_select %p405_p10, %s2668_s25, 1  ;;  %vm411_vm0 = vcmask 261120   ;;  %v2459_v7 = vld [vmem:[%s3062_s3 + $0x8] sm:$0xff]   ;;  %v2579_v9 = vmov 0.0   ;;  %v2461_v10 = vld [vmem:[%s3062_s3] sm:$0xff]   ;;  %vm2580_vm1 = vmmov 0  }
  0x17   : > { %v2460_v8 = vld [vmem:[%s3062_s3 + $0x28] sm:$0xff]   ;;  %2218 = vmatprep.subr.bf16.mxu1 %v2579_v9  ;;  %2234 = vmatprep.subr.bf16.mxu0 %v2579_v9  ;;  %v2462_v11 = vld [vmem:[%s3062_s3 + $0x20] sm:$0xff]   ;;  %v2463_v21 = vld [vmem:[%s3062_s3 + $0x18] sm:$0xff]   ;;  %vm1130_vm2 = vcmask 64512   ;;  %vm1358_vm3 = vcmask 1043456   ;;  %vm1950_vm4 = vcmask 785408  }
  0x18   : > { %s2074_s16 = sshll.u32 %s406_s15, 3  ;;  %2219 = vmatpush3.bf16.msra.mxu1 %v2459_v7  ;;  %2235 = vmatpush3.bf16.msra.mxu0 %v2460_v8  ;;  %v2075_v16 = vld [vmem:[%s3077_s1] ss:$0 sm:$0xff]  ;;  %v2464_v22 = vld [vmem:[%s3063_s4 + $0x8] sm:$0xff]   ;;  %v2465_v24 = vld [vmem:[%s3062_s3 + $0x10] sm:$0xff]   ;;  %s2073_s15 = sshll.u32 %s402_s29, 3 }
  0x19   : > { %s408_s19 = scalar_lea.vmem %s3076_s0, %s2074_s16  ;;  %2220 = vmatprep.subr.bf16.mxu1 %v2579_v9  ;;  %2236 = vmatprep.subr.bf16.mxu0 %v2579_v9  ;;  %v2076_v18 = vld [vmem:[%s3061_s2] ss:$0 sm:$0xff]  ;;  %v2467_v26 = vld [vmem:[%s3062_s3 + $0x38] sm:$0xff]   ;;  %v2468_v27 = vld [vmem:[%s3063_s4 + $0x28] sm:$0xff]   ;;  %s2142_s16 = sshll.u32 %s2668_s25, 7 }
  0x1a   : > { %v2700_v0 = vld [vmem:[%s408_s19] sm:$0xff]  ;;  %2222 = vmatprep.mubr.msk.bf16.mxu1 %vm2580_vm1, %v2579_v9  ;;  %2238 = vmatprep.mubr.msk.bf16.mxu0 %vm2580_vm1, %v2579_v9  ;;  %v2469_v28 = vld [vmem:[%s3062_s3 + $0x30] sm:$0xff]   ;;  %v2471_v30 = vld [vmem:[%s3063_s4 + $0x18] sm:$0xff]   ;;  %s404_s17 = scalar_lea.vmem [#allocation2], %s2073_s15  ;;  %s3017_s26 = scalar_lea.hbm %s3071_s12, %s2142_s16 }
  0x1b   : > { %v412_v1 = vsel %vm411_vm0, %v2700_v0, 0.0  ;;  %v2466_v25 = vld [vmem:[%s3063_s4] sm:$0xff]   ;;  %v2472_v31 = vld [vmem:[%s3064_s5 + $0x8] sm:$0xff]   ;;  %v2473_v32 = vld [vmem:[%s3063_s4 + $0x10] sm:$0xff]   ;;  %s2010_s18 = sshll.u32 %s404_s17, 4  ;;  %s1997_s25 = scalar_lea.sflag [#allocation3], %s402_s29  ;;  %s3019_s18 = int_to_ptr.vmem [resolvable:$true] %s2010_s18 }
  0x1c   : > { %413 = vadd.xlane.f32.xlu0 %v412_v1  ;;  %2221 = vmatpush3.bf16.msra.mxu1 %v2461_v10  ;;  %v2470_v29 = vld [vmem:[%s3063_s4 + $0x20] sm:$0xff]   ;;  %v2475_v34 = vld [vmem:[%s3063_s4 + $0x38] sm:$0xff]   ;;  %v2476_v35 = vld [vmem:[%s3064_s5 + $0x28] sm:$0xff]   ;;  %s2517_s28 = scalar_lea.vmem %s3019_s18, 128  ;;  %s2581_s15 = smov [#allocation2]  }
  0x1d   : > { %2237 = vmatpush3.bf16.msra.mxu0 %v2462_v11  ;;  %2226 = vmatprep.subr.bf16.mxu1 %v2579_v9  ;;  %v2474_v33 = vld [vmem:[%s3064_s5] sm:$0xff]   ;;  %v2477_v36 = vld [vmem:[%s3063_s4 + $0x30] sm:$0xff]   ;;  %v2479_v38 = vld [vmem:[%s3064_s5 + $0x18] sm:$0xff]   ;;  %p2518_p11 = scmp.ne.s32.totalorder %s3019_s18, %s2517_s28  ;;  %s2521_s0 = sshll.u32 %s2581_s15, 4  ;;  %s2522_s0 = int_to_ptr.vmem [resolvable:$false] %s2521_s0 }
  0x1e   : > { %2250 = vmatprep.subr.bf16.mxu0 %v2579_v9  ;;  %v2478_v37 = vld [vmem:[%s3064_s5 + $0x20] sm:$0xff]   ;;  %v2480_v39 = vld [vmem:[%s3064_s5 + $0x10] sm:$0xff]   ;;  %v2481_v40 = vld [vmem:[%s3064_s5 + $0x38] sm:$0xff]   ;;  %s2523_s16 = scalar_lea.vmem %s2522_s0, 256  ;;  %p2524_p0 = scmp.lt.s32.totalorder %s3019_s18, %s2522_s0 }
  0x1f   : > { %v2482_v41 = vld [vmem:[%s3064_s5 + $0x30] sm:$0xff]   ;;  %p2519_p12 = pnand %p2518_p11, %p2685_p5  ;;  %p2525_p1 = scmp.lt.s32.totalorder %s2523_s16, %s2517_s28 }
  0x21   : > { %p2520_p13 = pneg %p2519_p12  ;;  %p2526_p2 = por %p2525_p1, %p2524_p0 }
  0x23   : > { %p2527_p3 = pnand %p2526_p2, %p2520_p13 }
  0xa5   : > { %v414_v2 = vpop.xlane.xlu0 %413 }
  0xa6   : > { %v416_v3 = vmul.f32 0.03125, %v414_v2 }
  0xa8   : > { %v417_v4 = vsub.f32 %v2700_v0, %v416_v3 }
  0xaa   : > { %v418_v5 = vmul.f32 %v417_v4, %v417_v4 }
  0xac   : > { %v419_v6 = vsel %vm411_vm0, %v418_v5, 0.0 }
  0xad   : > { %420 = vadd.xlane.f32.xlu0 %v419_v6 }
 0x136   : > { %v421_v12 = vpop.xlane.xlu0 %420 }
 0x137   : > { %v422_v13 = vmul.f32 0.03125, %v421_v12 }
 0x139   : > { %v423_v14 = vadd.f32 1e-05, %v422_v13 }
 0x13b   : > { %2493 = vrsqrt.f32 %v423_v14 }
 0x148   : > { %v2494_v15 = vpop.eup %2493 }
 0x149   : > { %v425_v17 = vmul.f32 %v2494_v15, %v417_v4 }
 0x14b   : > { %v433_v19 = vmul.f32 %v2075_v16, %v425_v17 }
 0x14d   : > { %v441_v20 = vadd.f32 %v2076_v18, %v433_v19 }
 0x14f   : > { %v2740_v23 = vpack.c.bf16 %v441_v20, %v441_v20 }
 0x151   : > { %2223 = vmatmul.mubr.msk.bf16.vlgmr.msra.gmra.mxu1 %vm411_vm0, %v2740_v23  ;;  %2239 = vmatmul.mubr.msk.bf16.vlgmr.msra.gmra.mxu0 %vm411_vm0, %v2740_v23 }
 0x152   : > { %2227 = vmatpush3.bf16.msra.mxu1 %v2463_v21  ;;  %2251 = vmatpush3.bf16.msra.mxu0 %v2464_v22 }
 0x153   : > { %2228 = vmatprep.subr.bf16.mxu1 %v2579_v9  ;;  %2252 = vmatprep.subr.bf16.mxu0 %v2579_v9 }
 0x154   : > { %2230 = vmatprep.mubr.msk.bf16.mxu1 %vm2580_vm1, %v2579_v9  ;;  %2254 = vmatprep.mubr.msk.bf16.mxu0 %vm2580_vm1, %v2579_v9 }
 0x156   : > { %2229 = vmatpush3.bf16.msra.mxu1 %v2465_v24  ;;  %2253 = vmatpush3.bf16.msra.mxu0 %v2466_v25 }
 0x157   : > { %2242 = vmatprep.subr.bf16.mxu1 %v2579_v9  ;;  %2266 = vmatprep.subr.bf16.mxu0 %v2579_v9 }
 0x159   : > { %2231 = vmatmul.mubr.msk.bf16.vlgmr.msra.gmra.mxu1 %vm411_vm0, %v2740_v23  ;;  %2255 = vmatmul.mubr.msk.bf16.vlgmr.msra.gmra.mxu0 %vm411_vm0, %v2740_v23 }
 0x15a   : > { %2243 = vmatpush3.bf16.msra.mxu1 %v2467_v26  ;;  %2267 = vmatpush3.bf16.msra.mxu0 %v2468_v27 }
 0x15b   : > { %2244 = vmatprep.subr.bf16.mxu1 %v2579_v9  ;;  %2268 = vmatprep.subr.bf16.mxu0 %v2579_v9 }
 0x15c   : > { %2246 = vmatprep.mubr.msk.bf16.mxu1 %vm2580_vm1, %v2579_v9  ;;  %2270 = vmatprep.mubr.msk.bf16.mxu0 %vm2580_vm1, %v2579_v9 }
 0x15e   : > { %2245 = vmatpush3.bf16.msra.mxu1 %v2469_v28  ;;  %2269 = vmatpush3.bf16.msra.mxu0 %v2470_v29 }
 0x15f   : > { %2258 = vmatprep.subr.bf16.mxu1 %v2579_v9  ;;  %2282 = vmatprep.subr.bf16.mxu0 %v2579_v9 }
 0x161   : > { %2247 = vmatmul.mubr.msk.bf16.vlgmr.msra.gmra.mxu1 %vm411_vm0, %v2740_v23  ;;  %2271 = vmatmul.mubr.msk.bf16.vlgmr.msra.gmra.mxu0 %vm411_vm0, %v2740_v23 }
 0x162   : > { %2259 = vmatpush3.bf16.msra.mxu1 %v2471_v30  ;;  %2283 = vmatpush3.bf16.msra.mxu0 %v2472_v31 }
 0x163   : > { %2260 = vmatprep.subr.bf16.mxu1 %v2579_v9  ;;  %2284 = vmatprep.subr.bf16.mxu0 %v2579_v9 }
 0x164   : > { %2262 = vmatprep.mubr.msk.bf16.mxu1 %vm2580_vm1, %v2579_v9  ;;  %2286 = vmatprep.mubr.msk.bf16.mxu0 %vm2580_vm1, %v2579_v9 }
 0x166   : > { %2261 = vmatpush3.bf16.msra.mxu1 %v2473_v32  ;;  %2285 = vmatpush3.bf16.msra.mxu0 %v2474_v33 }
 0x167   : > { %2274 = vmatprep.subr.bf16.mxu1 %v2579_v9  ;;  %2298 = vmatprep.subr.bf16.mxu0 %v2579_v9 }
 0x169   : > { %2263 = vmatmul.mubr.msk.bf16.vlgmr.msra.gmra.mxu1 %vm411_vm0, %v2740_v23  ;;  %2287 = vmatmul.mubr.msk.bf16.vlgmr.msra.gmra.mxu0 %vm411_vm0, %v2740_v23 }
 0x16a   : > { %2275 = vmatpush3.bf16.msra.mxu1 %v2475_v34  ;;  %2299 = vmatpush3.bf16.msra.mxu0 %v2476_v35 }
 0x16b   : > { %2276 = vmatprep.subr.bf16.mxu1 %v2579_v9  ;;  %2300 = vmatprep.subr.bf16.mxu0 %v2579_v9 }
 0x16c   : > { %2278 = vmatprep.mubr.msk.bf16.mxu1 %vm2580_vm1, %v2579_v9  ;;  %2302 = vmatprep.mubr.msk.bf16.mxu0 %vm2580_vm1, %v2579_v9 }
 0x16e   : > { %2277 = vmatpush3.bf16.msra.mxu1 %v2477_v36  ;;  %2301 = vmatpush3.bf16.msra.mxu0 %v2478_v37 }
 0x16f   : > { %2290 = vmatprep.subr.bf16.mxu1 %v2579_v9  ;;  %2314 = vmatprep.subr.bf16.mxu0 %v2579_v9 }
 0x171   : > { %2279 = vmatmul.mubr.msk.bf16.vlgmr.msra.gmra.mxu1 %vm411_vm0, %v2740_v23  ;;  %2303 = vmatmul.mubr.msk.bf16.vlgmr.msra.gmra.mxu0 %vm411_vm0, %v2740_v23 }
 0x172   : > { %2291 = vmatpush3.bf16.msra.mxu1 %v2479_v38  ;;  %2294 = vmatprep.mubr.msk.bf16.mxu1 %vm2580_vm1, %v2579_v9 }
 0x173   : > { %2292 = vmatprep.subr.bf16.mxu1 %v2579_v9  ;;  %2316 = vmatprep.mubr.msk.bf16.mxu0 %vm2580_vm1, %v2579_v9 }
 0x176   : > { %2293 = vmatpush3.bf16.msra.mxu1 %v2480_v39 }
 0x177   : > { %2306 = vmatprep.subr.bf16.mxu1 %v2579_v9 }
 0x179   : > { %2295 = vmatmul.mubr.msk.bf16.vlgmr.msra.gmra.mxu1 %vm411_vm0, %v2740_v23 }
 0x17a   : > { %2307 = vmatpush3.bf16.msra.mxu1 %v2481_v40  ;;  %2310 = vmatprep.mubr.msk.bf16.mxu1 %vm2580_vm1, %v2579_v9 }
 0x17b   : > { %2308 = vmatprep.subr.bf16.mxu1 %v2579_v9 }
 0x17e   : > { %2309 = vmatpush3.bf16.msra.mxu1 %v2482_v41 }
 0x17f   : > { %2320 = vmatprep.subr.bf16.mxu1 %v2579_v9 }
 0x181   : > { %2311 = vmatmul.mubr.msk.bf16.vlgmr.msra.gmra.mxu1 %vm411_vm0, %v2740_v23 }
 0x182   : > { %2322 = vmatprep.mubr.msk.bf16.mxu1 %vm2580_vm1, %v2579_v9 }
 0x211   : > { %v508_v42 = vpop.f32.mrf.mxu1  ;;  %v612_v43 = vpop.f32.mrf.mxu0 }
 0x212   : > { %v1118_v62 = vpack.c.bf16 %v508_v42, %v508_v42  ;;  %v1120_v11 = vpack.c.bf16 %v612_v43, %v612_v43 }
 0x213   : > { %v2224_v44 = vpop.f32.mrf.mxu1  ;;  %v2240_v45 = vpop.f32.mrf.mxu0 }
 0x215   : > { %v511_v46 = vpop.f32.mrf.mxu1  ;;  %v615_v47 = vpop.f32.mrf.mxu0 }
 0x217   : > { %v2225_v48 = vpop.f32.mrf.mxu1  ;;  %v2241_v49 = vpop.f32.mrf.mxu0 }
 0x219   : > { %v560_v50 = vpop.f32.mrf.mxu1  ;;  %v732_v51 = vpop.f32.mrf.mxu0 }
 0x21a   : > { %v1122_v52 = vpack.c.bf16 %v732_v51, %v732_v51  ;;  %v1119_v24 = vpack.c.bf16 %v560_v50, %v560_v50 }
 0x21b   : > { %v2232_v53 = vpop.f32.mrf.mxu1  ;;  %v2256_v54 = vpop.f32.mrf.mxu0 }
 0x21c   : > { %v1135_v55 = vsel %vm1130_vm2, %v1122_v52, 0 }
 0x21d   : > { %v563_v56 = vpop.f32.mrf.mxu1  ;;  %v735_v57 = vpop.f32.mrf.mxu0  ;;  %2315 = vmatpush3.bf16.xpose.msra.mxu0 %v1135_v55 }
 0x21e   : > { %2326 = vmatprep.subr.bf16.mxu0 %v2579_v9 }
 0x21f   : > { %v2233_v58 = vpop.f32.mrf.mxu1  ;;  %v2257_v59 = vpop.f32.mrf.mxu0 }
 0x221   : > { %v664_v60 = vpop.f32.mrf.mxu1  ;;  %v836_v61 = vpop.f32.mrf.mxu0 }
 0x222   : > { %v1124_v63 = vpack.c.bf16 %v836_v61, %v836_v61  ;;  %v1121_v34 = vpack.c.bf16 %v664_v60, %v664_v60 }
 0x223   : > { %v2248_v1 = vpop.f32.mrf.mxu1  ;;  %v2272_v2 = vpop.f32.mrf.mxu0 }
 0x224   : > { %v1227_v3 = vsel %vm1130_vm2, %v1124_v63, 0  ;;  %2317 = vmatmul.mubr.msk.bf16.vlgmr.msra.gmra.mxu0 %vm1130_vm2, %v1118_v62 }
 0x225   : > { %v667_v4 = vpop.f32.mrf.mxu1  ;;  %v839_v5 = vpop.f32.mrf.mxu0  ;;  %2327 = vmatpush3.bf16.xpose.msra.mxu0 %v1227_v3  ;;  %2328 = vmatprep.mubr.msk.bf16.mxu0 %vm2580_vm1, %v2579_v9 }
 0x226   : > { %2338 = vmatprep.subr.bf16.mxu0 %v2579_v9 }
 0x227   : > { %v2249_v6 = vpop.f32.mrf.mxu1  ;;  %v2273_v7 = vpop.f32.mrf.mxu0 }
 0x229   : > { %v784_v8 = vpop.f32.mrf.mxu1  ;;  %v956_v10 = vpop.f32.mrf.mxu0 }
 0x22a   : > { %v1123_v12 = vpack.c.bf16 %v784_v8, %v784_v8  ;;  %v1126_v13 = vpack.c.bf16 %v956_v10, %v956_v10 }
 0x22b   : > { %v2264_v14 = vpop.f32.mrf.mxu1  ;;  %v2288_v15 = vpop.f32.mrf.mxu0 }
 0x22c   : > { %v1181_v16 = vsel %vm1130_vm2, %v1123_v12, 0  ;;  %v1360_v17 = vsel %vm1358_vm3, %v1126_v13, 0  ;;  %2329 = vmatmul.mubr.msk.bf16.vlgmr.msra.gmra.mxu0 %vm1130_vm2, %v1120_v11 }
 0x22d   : > { %v787_v18 = vpop.f32.mrf.mxu1  ;;  %v959_v19 = vpop.f32.mrf.mxu0  ;;  %2321 = vmatpush3.bf16.xpose.msra.mxu1 %v1181_v16  ;;  %2339 = vmatpush3.bf16.msra.mxu0 %v1360_v17 }
 0x22e   : > { %2332 = vmatprep.subr.bf16.mxu1 %v2579_v9  ;;  %2340 = vmatprep.mubr.msk.bf16.mxu0 %vm2580_vm1, %v2579_v9 }
 0x22f   : > { %v2265_v20 = vpop.f32.mrf.mxu1  ;;  %v2289_v21 = vpop.f32.mrf.mxu0  ;;  %2350 = vmatprep.subr.bf16.mxu0 %v2579_v9 }
 0x231   : > { %v888_v22 = vpop.f32.mrf.mxu1  ;;  %v2878_v23 = vpop.f32.mrf.mxu0 }
 0x232   : > { %v1125_v25 = vpack.c.bf16 %v888_v22, %v888_v22  ;;  %v1128_v8 = vpack.c.bf16 %v2878_v23, %v2878_v23 }
 0x233   : > { %v2280_v26 = vpop.f32.mrf.mxu1  ;;  %v2304_v27 = vpop.f32.mrf.mxu0 }
 0x234   : > { %v1273_v28 = vsel %vm1130_vm2, %v1125_v25, 0  ;;  %2323 = vmatmul.mubr.msk.bf16.vlgmr.msra.gmra.mxu1 %vm1130_vm2, %v1119_v24  ;;  %v1452_v15 = vsel %vm1358_vm3, %v1128_v8, 0 }
 0x235   : > { %v891_v29 = vpop.f32.mrf.mxu1  ;;  %v1063_v30 = vpop.f32.mrf.mxu0  ;;  %2333 = vmatpush3.bf16.xpose.msra.mxu1 %v1273_v28  ;;  %2334 = vmatprep.mubr.msk.bf16.mxu1 %vm2580_vm1, %v2579_v9 }
 0x236   : > { %2344 = vmatprep.subr.bf16.mxu1 %v2579_v9  ;;  %v1552_v30 = vld [vmem:[%s3065_s6] sm:$0xf] }
 0x237   : > { %v2281_v31 = vpop.f32.mrf.mxu1  ;;  %v2305_v32 = vpop.f32.mrf.mxu0 }
 0x238   : > { %v1560_v31 = vsel %vm1358_vm3, %v1552_v30, 0  ;;  %v1553_v32 = vld [vmem:[%s3065_s6 + $0x4] sm:$0xf] }
 0x239   : > { %v1008_v33 = vpop.f32.mrf.mxu1 }
 0x23a   : > { %v1127_v35 = vpack.c.bf16 %v1008_v33, %v1008_v33  ;;  %v1606_v33 = vsel %vm1358_vm3, %v1553_v32, 0 }
 0x23b   : > { %v2296_v36 = vpop.f32.mrf.mxu1 }
 0x23c   : > { %v1406_v37 = vsel %vm1358_vm3, %v1127_v35, 0  ;;  %2335 = vmatmul.mubr.msk.bf16.vlgmr.msra.gmra.mxu1 %vm1130_vm2, %v1121_v34 }
 0x23d   : > { %v1011_v38 = vpop.f32.mrf.mxu1  ;;  %2345 = vmatpush3.bf16.msra.mxu1 %v1406_v37  ;;  %2346 = vmatprep.mubr.msk.bf16.mxu1 %vm2580_vm1, %v2579_v9 }
 0x23e   : > { %2356 = vmatprep.subr.bf16.mxu1 %v2579_v9 }
 0x23f   : > { %v2297_v39 = vpop.f32.mrf.mxu1 }
 0x240   : > { %v1554_v39 = vld [vmem:[%s3065_s6 + $0x8] sm:$0xf] }
 0x241   : > { %v2890_v40 = vpop.f32.mrf.mxu1 }
 0x242   : > { %v1129_v22 = vpack.c.bf16 %v2890_v40, %v2890_v40 }
 0x243   : > { %v2312_v41 = vpop.f32.mrf.mxu1 }
 0x244   : > { %v1498_v26 = vsel %vm1358_vm3, %v1129_v22, 0 }
 0x245   : > { %v1115_v42 = vpop.f32.mrf.mxu1 }
 0x247   : > { %v2313_v43 = vpop.f32.mrf.mxu1 }
 0x248   : > { %v1652_v43 = vsel %vm1358_vm3, %v1554_v39, 0  ;;  %v2485_v39 = vld [vmem:[%s3068_s9] sm:$0xff]  }
 0x2e4   : > { %v1171_v44 = vpop.f32.mrf.mxu0 }
 0x2e5   : > { %v1315_v45 = vsel %vm1130_vm2, %v1171_v44, -inf }
 0x2e6   : > { %1316 = vmax.xlane.f32.xlu1 %v1315_v45  ;;  %v2318_v46 = vpop.f32.mrf.mxu0 }
 0x2e8   : > { %v1174_v47 = vpop.f32.mrf.mxu0 }
 0x2ea   : > { %v2319_v48 = vpop.f32.mrf.mxu0 }
 0x2ec   : > { %v1263_v49 = vpop.f32.mrf.mxu0 }
 0x2ed   : > { %v1321_v50 = vsel %vm1130_vm2, %v1263_v49, -inf }
 0x2ee   : > { %1322 = vmax.xlane.f32.xlu0 %v1321_v50  ;;  %v2330_v51 = vpop.f32.mrf.mxu0 }
 0x2f0   : > { %v1266_v52 = vpop.f32.mrf.mxu0 }
 0x2f2   : > { %v2331_v53 = vpop.f32.mrf.mxu0 }
 0x2f4   : > { %v1217_v54 = vpop.f32.mrf.mxu1 }
 0x2f5   : > { %v1318_v55 = vsel %vm1130_vm2, %v1217_v54, -inf }
 0x2f6   : > { %1319 = vmax.xlane.f32.xlu1 %v1318_v55  ;;  %v2324_v56 = vpop.f32.mrf.mxu1 }
 0x2f7   : > { %v1555_v56 = vld [vmem:[%s3065_s6 + $0xc] sm:$0xf] }
 0x2f8   : > { %v1220_v57 = vpop.f32.mrf.mxu1 }
 0x2fa   : > { %v2325_v58 = vpop.f32.mrf.mxu1 }
 0x2fc   : > { %v1309_v59 = vpop.f32.mrf.mxu1 }
 0x2fd   : > { %v1324_v60 = vsel %vm1130_vm2, %v1309_v59, -inf }
 0x2fe   : > { %1325 = vmax.xlane.f32.xlu1 %v1324_v60  ;;  %v2336_v61 = vpop.f32.mrf.mxu1  ;;  %v1698_v60 = vsel %vm1358_vm3, %v1555_v56, 0  ;;  %v2492_v56 = vld [vmem:[%s3070_s11] sm:$0xff]  }
 0x300   : > { %v1312_v62 = vpop.f32.mrf.mxu1 }
 0x302   : > { %v2337_v63 = vpop.f32.mrf.mxu1 }
 0x36f   : > { %v1317_v1 = vpop.xlane.xlu1 %1316 }
 0x370   : > { %v1327_v2 = vsub.f32 %v1171_v44, %v1317_v1 }
 0x372   : > { %v1331_v3 = vmul.f32 1.442695, %v1327_v2 }
 0x374   : > { %2495 = vpow2.f32 %v1331_v3 }
 0x377   : > { %v1323_v4 = vpop.xlane.xlu0 %1322 }
 0x378   : > { %v1329_v5 = vsub.f32 %v1263_v49, %v1323_v4 }
 0x37a   : > { %v1335_v6 = vmul.f32 1.442695, %v1329_v5 }
 0x37c   : > { %2497 = vpow2.f32 %v1335_v6 }
 0x37f   : > { %v1320_v7 = vpop.xlane.xlu1 %1319 }
 0x380   : > { %v1328_v10 = vsub.f32 %v1217_v54, %v1320_v7 }
 0x381   : > { %v2496_v11 = vpop.eup %2495 }
 0x382   : > { %v1333_v12 = vmul.f32 1.442695, %v1328_v10  ;;  %v1339_v13 = vsel %vm1130_vm2, %v2496_v11, 0.0  ;;  %v1351_v14 = vpack.c.bf16 %v2496_v11, %v2496_v11 }
 0x383   : > { %1340 = vadd.xlane.f32.xlu0 %v1339_v13 }
 0x384   : > { %2499 = vpow2.f32 %v1333_v12  ;;  %2341 = vmatmul.mubr.msk.bf16.vlgmr.msra.gmra.mxu0 %vm1130_vm2, %v1351_v14 }
 0x385   : > { %2351 = vmatpush3.bf16.msra.mxu0 %v1452_v15  ;;  %2352 = vmatprep.mubr.msk.bf16.mxu0 %vm2580_vm1, %v2579_v9 }
 0x386   : > { %2362 = vmatprep.subr.bf16.mxu0 %v2579_v9 }
 0x387   : > { %v1326_v16 = vpop.xlane.xlu1 %1325 }
 0x388   : > { %v1330_v17 = vsub.f32 %v1309_v59, %v1326_v16 }
 0x389   : > { %v2498_v18 = vpop.eup %2497 }
 0x38a   : > { %v1337_v19 = vmul.f32 1.442695, %v1330_v17  ;;  %v1345_v20 = vsel %vm1130_vm2, %v2498_v18, 0.0  ;;  %v1353_v21 = vpack.c.bf16 %v2498_v18, %v2498_v18 }
 0x38b   : > { %1346 = vadd.xlane.f32.xlu0 %v1345_v20 }
 0x38c   : > { %2501 = vpow2.f32 %v1337_v19  ;;  %2353 = vmatmul.mubr.msk.bf16.vlgmr.msra.gmra.mxu0 %vm1130_vm2, %v1353_v21 }
 0x38d   : > { %2364 = vmatprep.mubr.msk.bf16.mxu0 %vm2580_vm1, %v2579_v9  ;;  %2363 = vmatpush3.bf16.msra.mxu0 %v1560_v31 }
 0x38e   : > { %2374 = vmatprep.subr.bf16.mxu0 %v2579_v9 }
 0x391   : > { %v2500_v23 = vpop.eup %2499 }
 0x392   : > { %v1342_v24 = vsel %vm1130_vm2, %v2500_v23, 0.0  ;;  %v1352_v25 = vpack.c.bf16 %v2500_v23, %v2500_v23 }
 0x393   : > { %1343 = vadd.xlane.f32.xlu1 %v1342_v24 }
 0x394   : > { %2347 = vmatmul.mubr.msk.bf16.vlgmr.msra.gmra.mxu1 %vm1130_vm2, %v1352_v25 }
 0x395   : > { %2357 = vmatpush3.bf16.msra.mxu1 %v1498_v26  ;;  %2358 = vmatprep.mubr.msk.bf16.mxu1 %vm2580_vm1, %v2579_v9 }
 0x396   : > { %2368 = vmatprep.subr.bf16.mxu1 %v2579_v9 }
 0x399   : > { %v2502_v27 = vpop.eup %2501 }
 0x39a   : > { %v1348_v28 = vsel %vm1130_vm2, %v2502_v27, 0.0  ;;  %v1354_v29 = vpack.c.bf16 %v2502_v27, %v2502_v27 }
 0x39b   : > { %1349 = vadd.xlane.f32.xlu1 %v1348_v28 }
 0x39c   : > { %2359 = vmatmul.mubr.msk.bf16.vlgmr.msra.gmra.mxu1 %vm1130_vm2, %v1354_v29 }
 0x39d   : > { %2370 = vmatprep.mubr.msk.bf16.mxu1 %vm2580_vm1, %v2579_v9  ;;  %2369 = vmatpush3.bf16.msra.mxu1 %v1606_v33 }
 0x39e   : > { %2380 = vmatprep.subr.bf16.mxu1 %v2579_v9 }
 0x40c   : > { %v1341_v34 = vpop.xlane.xlu0 %1340 }
 0x40d   : > { %2503 = vrcp.f32 %v1341_v34 }
 0x414   : > { %v1347_v35 = vpop.xlane.xlu0 %1346 }
 0x415   : > { %2505 = vrcp.f32 %v1347_v35 }
 0x41a   : > { %v2504_v36 = vpop.eup %2503 }
 0x41c   : > { %v1344_v37 = vpop.xlane.xlu1 %1343 }
 0x41d   : > { %2507 = vrcp.f32 %v1344_v37 }
 0x422   : > { %v2506_v46 = vpop.eup %2505 }
 0x424   : > { %v1350_v47 = vpop.xlane.xlu1 %1349 }
 0x425   : > { %2509 = vrcp.f32 %v1350_v47  ;;  %v2126_v47 = vld [vmem:[%s3067_s8] ss:$0 sm:$0xff] }
 0x42a   : > { %v2508_v54 = vpop.eup %2507 }
 0x432   : > { %v2510_v63 = vpop.eup %2509 }
 0x444   : > { %v1396_v38 = vpop.f32.mrf.mxu0 }
 0x445   : > { %v1544_v40 = vmul.f32 %v2504_v36, %v1396_v38  ;;  %v2483_v38 = vld [vmem:[%s3068_s9 + $0x8] sm:$0xff]  }
 0x446   : > { %v2342_v41 = vpop.f32.mrf.mxu0 }
 0x447   : > { %v1548_v42 = vpack.c.bf16 %v1544_v40, %v1544_v40  ;;  %v2486_v40 = vld [vmem:[%s3069_s10] sm:$0xff]  }
 0x448   : > { %v1399_v44 = vpop.f32.mrf.mxu0 }
 0x449   : > { %2365 = vmatmul.mubr.msk.bf16.vlgmr.msra.gmra.mxu0 %vm1130_vm2, %v1548_v42 }
 0x44a   : > { %v2343_v45 = vpop.f32.mrf.mxu0  ;;  %2375 = vmatpush3.bf16.msra.mxu0 %v1652_v43  ;;  %2376 = vmatprep.mubr.msk.bf16.mxu0 %vm2580_vm1, %v2579_v9 }
 0x44b   : > { %2386 = vmatprep.subr.bf16.mxu0 %v2579_v9  ;;  %v2125_v45 = vld [vmem:[%s3066_s7] ss:$0 sm:$0xff] }
 0x44c   : > { %v1488_v48 = vpop.f32.mrf.mxu0 }
 0x44d   : > { %v1546_v49 = vmul.f32 %v2506_v46, %v1488_v48 }
 0x44e   : > { %v2354_v50 = vpop.f32.mrf.mxu0 }
 0x44f   : > { %v1550_v51 = vpack.c.bf16 %v1546_v49, %v1546_v49 }
 0x450   : > { %v1491_v52 = vpop.f32.mrf.mxu0 }
 0x451   : > { %2377 = vmatmul.mubr.msk.bf16.vlgmr.msra.gmra.mxu0 %vm1130_vm2, %v1550_v51  ;;  %v2487_v51 = vld [vmem:[%s3070_s11 + $0x28] sm:$0xff]   ;;  %v2488_v52 = vld [vmem:[%s3070_s11 + $0x20] sm:$0xff]  }
 0x452   : > { %v2355_v53 = vpop.f32.mrf.mxu0  ;;  %2390 = vmatprep.mubr.msk.bf16.mxu0 %vm2580_vm1, %v2579_v9  ;;  %2387 = vmatpush3.bf16.msra.mxu0 %v2483_v38 }
 0x453   : > { %2388 = vmatprep.subr.bf16.mxu0 %v2579_v9  ;;  %v2489_v53 = vld [vmem:[%s3070_s11 + $0x18] sm:$0xff]  }
 0x454   : > { %v1442_v55 = vpop.f32.mrf.mxu1 }
 0x455   : > { %v1545_v57 = vmul.f32 %v2508_v54, %v1442_v55  ;;  %v2490_v54 = vld [vmem:[%s3070_s11 + $0x10] sm:$0xff]   ;;  %v2491_v55 = vld [vmem:[%s3070_s11 + $0x8] sm:$0xff]  }
 0x456   : > { %v2348_v58 = vpop.f32.mrf.mxu1  ;;  %2389 = vmatpush3.bf16.msra.mxu0 %v2485_v39 }
 0x457   : > { %v1549_v59 = vpack.c.bf16 %v1545_v57, %v1545_v57  ;;  %2402 = vmatprep.subr.bf16.mxu0 %v2579_v9 }
 0x458   : > { %v1445_v61 = vpop.f32.mrf.mxu1 }
 0x459   : > { %2371 = vmatmul.mubr.msk.bf16.vlgmr.msra.gmra.mxu1 %vm1130_vm2, %v1549_v59 }
 0x45a   : > { %v2349_v62 = vpop.f32.mrf.mxu1  ;;  %2381 = vmatpush3.bf16.msra.mxu1 %v1698_v60  ;;  %2382 = vmatprep.mubr.msk.bf16.mxu1 %vm2580_vm1, %v2579_v9 }
 0x45b   : > { %2394 = vmatprep.subr.bf16.mxu1 %v2579_v9 }
 0x45c   : > { %v1534_v1 = vpop.f32.mrf.mxu1 }
 0x45d   : > { %v1547_v2 = vmul.f32 %v2510_v63, %v1534_v1 }
 0x45e   : > { %v2360_v3 = vpop.f32.mrf.mxu1 }
 0x45f   : > { %v1551_v4 = vpack.c.bf16 %v1547_v2, %v1547_v2 }
 0x460   : > { %v1537_v5 = vpop.f32.mrf.mxu1 }
 0x461   : > { %2383 = vmatmul.mubr.msk.bf16.vlgmr.msra.gmra.mxu1 %vm1130_vm2, %v1551_v4 }
 0x462   : > { %v2361_v6 = vpop.f32.mrf.mxu1  ;;  %2398 = vmatprep.mubr.msk.bf16.mxu1 %vm2580_vm1, %v2579_v9 }
 0x509   : > { %v1596_v7 = vpop.f32.mrf.mxu0 }
 0x50a   : > { %v1740_v19 = vsel %vm411_vm0, %v1596_v7, 0.0 }
 0x50b   : > { %v2366_v8 = vpop.f32.mrf.mxu0 }
 0x50d   : > { %v1599_v10 = vpop.f32.mrf.mxu0 }
 0x50f   : > { %v2367_v11 = vpop.f32.mrf.mxu0 }
 0x511   : > { %v1688_v12 = vpop.f32.mrf.mxu0 }
 0x512   : > { %v1743_v23 = vsel %vm411_vm0, %v1688_v12, 0.0 }
 0x513   : > { %v2378_v13 = vpop.f32.mrf.mxu0 }
 0x515   : > { %v1691_v14 = vpop.f32.mrf.mxu0 }
 0x517   : > { %v2379_v15 = vpop.f32.mrf.mxu0 }
 0x519   : > { %v1642_v16 = vpop.f32.mrf.mxu1 }
 0x51a   : > { %v1741_v17 = vsel %vm411_vm0, %v1642_v16, 0.0 }
 0x51b   : > { %v2372_v18 = vpop.f32.mrf.mxu1  ;;  %v1742_v20 = vadd.f32 %v1741_v17, %v1740_v19 }
 0x51d   : > { %v1645_v21 = vpop.f32.mrf.mxu1  ;;  %v1744_v25 = vadd.f32 %v1743_v23, %v1742_v20 }
 0x51f   : > { %v2373_v22 = vpop.f32.mrf.mxu1 }
 0x521   : > { %v1734_v24 = vpop.f32.mrf.mxu1 }
 0x522   : > { %v1745_v26 = vsel %vm411_vm0, %v1734_v24, 0.0 }
 0x523   : > { %v1746_v27 = vadd.f32 %v1745_v26, %v1744_v25  ;;  %v2384_v28 = vpop.f32.mrf.mxu1 }
 0x525   : > { %v2957_v29 = vadd.f32 %v1746_v27, %v2700_v0  ;;  %v1737_v30 = vpop.f32.mrf.mxu1  ;;  %v2484_v0 = vld [vmem:[%s3069_s10 + $0x8] sm:$0xff]  }
 0x526   : > { %2395 = vmatpush3.bf16.msra.mxu1 %v2484_v0 }
 0x527   : > { %v2385_v31 = vpop.f32.mrf.mxu1  ;;  %v1748_v32 = vsel %vm411_vm0, %v2957_v29, 0.0  ;;  %2396 = vmatprep.subr.bf16.mxu1 %v2579_v9 }
 0x528   : > { %1749 = vadd.xlane.f32.xlu0 %v1748_v32 }
 0x52a   : > { %2397 = vmatpush3.bf16.msra.mxu1 %v2486_v40 }
 0x5b1   : > { %v1750_v33 = vpop.xlane.xlu0 %1749 }
 0x5b2   : > { %v1751_v34 = vmul.f32 0.03125, %v1750_v33 }
 0x5b4   : > { %v1752_v35 = vsub.f32 %v2957_v29, %v1751_v34 }
 0x5b6   : > { %v1753_v36 = vmul.f32 %v1752_v35, %v1752_v35 }
 0x5b8   : > { %v1754_v37 = vsel %vm411_vm0, %v1753_v36, 0.0 }
 0x5b9   : > { %1755 = vadd.xlane.f32.xlu1 %v1754_v37 }
 0x642   : > { %v1756_v41 = vpop.xlane.xlu1 %1755 }
 0x643   : > { %v1757_v42 = vmul.f32 0.03125, %v1756_v41 }
 0x645   : > { %v1758_v43 = vadd.f32 1e-05, %v1757_v42 }
 0x647   : > { %2511 = vrsqrt.f32 %v1758_v43 }
 0x654   : > { %v2512_v44 = vpop.eup %2511 }
 0x655   : > { %v1760_v46 = vmul.f32 %v2512_v44, %v1752_v35 }
 0x657   : > { %v1768_v48 = vmul.f32 %v2125_v45, %v1760_v46 }
 0x659   : > { %v1776_v49 = vadd.f32 %v2126_v47, %v1768_v48 }
 0x65b   : > { %v1777_v50 = vpack.c.bf16 %v1776_v49, %v1776_v49 }
 0x65d   : > { %2391 = vmatmul.mubr.msk.bf16.vlgmr.msra.gmra.mxu0 %vm411_vm0, %v1777_v50  ;;  %2399 = vmatmul.mubr.msk.bf16.vlgmr.msra.gmra.mxu1 %vm411_vm0, %v1777_v50 }
 0x65e   : > { %2414 = vmatprep.mubr.msk.bf16.mxu0 %vm2580_vm1, %v2579_v9  ;;  %2403 = vmatpush3.bf16.msra.mxu0 %v2487_v51 }
 0x65f   : > { %2404 = vmatprep.subr.bf16.mxu0 %v2579_v9 }
 0x662   : > { %2405 = vmatpush3.bf16.msra.mxu0 %v2488_v52 }
 0x663   : > { %2406 = vmatprep.subr.bf16.mxu0 %v2579_v9 }
 0x666   : > { %2407 = vmatpush3.bf16.msra.mxu0 %v2489_v53 }
 0x667   : > { %2408 = vmatprep.subr.bf16.mxu0 %v2579_v9 }
 0x66a   : > { %2409 = vmatpush3.bf16.msra.mxu0 %v2490_v54 }
 0x66b   : > { %2410 = vmatprep.subr.bf16.mxu0 %v2579_v9 }
 0x66e   : > { %2411 = vmatpush3.bf16.msra.mxu0 %v2491_v55 }
 0x66f   : > { %2412 = vmatprep.subr.bf16.mxu0 %v2579_v9 }
 0x672   : > { %2413 = vmatpush3.bf16.msra.mxu0 %v2492_v56 }
 0x71d   : > { %v1831_v57 = vpop.f32.mrf.mxu0  ;;  %v1887_v58 = vpop.f32.mrf.mxu1 }
 0x71e   : > { %v2133_v59 = vmul.f32 -1.442695, %v1831_v57 }
 0x71f   : > { %v2392_v60 = vpop.f32.mrf.mxu0  ;;  %v2400_v61 = vpop.f32.mrf.mxu1 }
 0x720   : > { %2513 = vpow2.f32 %v2133_v59 }
 0x721   : > { %v1834_v62 = vpop.f32.mrf.mxu0  ;;  %v1890_v63 = vpop.f32.mrf.mxu1 }
 0x723   : > { %v2393_v1 = vpop.f32.mrf.mxu0  ;;  %v2401_v2 = vpop.f32.mrf.mxu1 }
 0x72d   : > { %v2514_v3 = vpop.eup %2513 }
 0x72e   : > { %v1896_v4 = vadd.f32 1.0, %v2514_v3 }
 0x730   : > { %2515 = vrcp.f32 %v1896_v4 }
 0x73d   : > { %v2516_v9 = vpop.eup %2515 }
 0x73e   : > { %v1899_v5 = vmul.f32 %v2516_v9, %v1831_v57 }
 0x740   : > { %v1900_v6 = vmul.f32 %v1899_v5, %v1887_v58 }
 0x742   : > { %v1901_v7 = vpack.c.bf16 %v1900_v6, %v1900_v6 }
 0x744   : > { %2415 = vmatmul.mubr.msk.bf16.vlgmr.msra.gmra.mxu0 %vm1950_vm4, %v1901_v7 }
 0x804   : > { %v1988_v8 = vpop.f32.mrf.mxu0 }
 0x805   : > { %v1994_v10 = vadd.f32 %v1988_v8, %v2957_v29 }
 0x806   : > { %v2416_v11 = vpop.f32.mrf.mxu0 }
 0x807   : > { %1995 = vst.msk [vmem:[%s404_s17] sm:$0xff] %vm411_vm0, %v1994_v10 }
 0x808   : > { %v1991_v12 = vpop.f32.mrf.mxu0 }
 0x809   : > { %2530 = shalt.err (!%p2527_p3)
}
 0x80a   : > { %s2531_s17 = scalar_lea.hbm %s3017_s26, 128  ;;  %s2535_s20 = scalar_lea.hbm %s3071_s12, 256 }
 0x80b   : > { %p2532_p4 = scmp.ne.s32.totalorder %s3017_s26, %s2531_s17  ;;  %p2536_p9 = scmp.lt.s32.totalorder %s3017_s26, %s3071_s12 }
 0x80c   : > { %p2537_p10 = scmp.lt.s32.totalorder %s2535_s20, %s2531_s17 }
 0x80d   : > { %p2533_p7 = pnand %p2532_p4, %p2685_p5 }
 0x80e   : > { %p2538_p11 = por %p2537_p10, %p2536_p9 }
 0x80f   : > { %p2534_p8 = pneg %p2533_p7 }
 0x811   : > { %p2539_p12 = pnand %p2538_p11, %p2534_p8 }
 0x813   : > { %2542 = shalt.err (!%p2539_p12)
}
 0x814   : > { %2418 = dma.vmem_to_hbm [thread:$0]  (%p2685_p5), %s3019_s18, 128, %s3017_s26, %s1997_s25   ;;  %v2417_v13 = vpop.f32.mrf.mxu0 }
 0x815 PF: > { %p2424_p13 = scmp.ge.s32.totalorder %s2577_s24, 2  ;;  %s2022_s0 = sand.u32 1, %s2565_s21  }
 0x816   : > { %s2023_s1 = scalar_lea.sflag [#allocation3], %s2022_s0 }
 0x817   : > { %p2421_p0 = pnand %p2424_p13, %p2689_p6 }
 0x819   : > { %p2422_p1 = pneg %p2421_p0 }
 0x81b   : > { %2560 = dma.done.wait (%p2422_p1), %s2023_s1, 128  }
 0x81c   : > { %2562 = vsyncadd (%p2422_p1), %s2023_s1, 4294967168  ;;  %p22_p2 = scmp.ge.s32.totalorder %s2672_s27, 4   ;;  %s3078_s21 = smov %s2569_s22 }
 0x81d   : > { %s3079_s22 = smov %s2573_s23  ;;  %s3080_s23 = smov %s2683_s30 }
 0x81e   : > { %s3081_s24 = smov %s2672_s27  ;;  %24 = sbr.rel (!%p22_p2) target bundleno = 6 (0x6), region = 103 }
 0x823   :  { %2028 = vsyncpa [#allocation3], 1 }
 0x824   :  { %2030 = vsyncpa [#allocation3 + $0x1], 1 }

</bundles_post_ra>
